<compile_context>
chip_gen: v6e
topology: v6e:2x2x1
jax: 0.10.0
libtpu: 0.0.40
codegen_flags: <defaults>
</compile_context>

<pallas_src>
import functools

import jax
import jax.numpy as jnp
from jax.experimental import pallas as pl
from jax.experimental.pallas import tpu as pltpu

K_PAD = 8            # conv taps (3/5/7) zero-padded to 8 -> one shared tap layout
NEG = -1e30          # additive mask for padded time positions before the max
OUT_PAD_LANES = 128  # lane-dense final output (caller slices to out_channels)
# (channel, kernel_size, right-trim): conv3/5/7 on ch0, tconv3/5/7 on ch1..3 trimmed
CONV_SPECS = ((0, 3, 0), (0, 5, 0), (0, 7, 0), (1, 3, 2), (2, 5, 4), (3, 7, 6))


# ------------------------------ fused kernel --------------------------------

def _sdn_kernel(patches_ref, vlen_ref,
                wconv_ref, bconv_ref, wff_ref, bff_ref,
                alow_ref, wlow_ref, blow_ref,
                wagg_ref, bagg_ref,
                aup_ref, wup_ref, bup_ref,
                wdisc_ref, bdisc_ref, wfc_ref, bfc_ref,
                out_ref, *, B, L, NN, NG, GH):
    f32, bf16 = jnp.float32, jnp.bfloat16
    TB = 2 * B                        # both branches stacked along rows

    # [1] multiscale CNN: every (branch, node, scale, time) conv as ONE
    #     block-diagonal MXU matmul; mask invalid time steps (in-kernel iota)
    #     and max-pool over time (conv bias commutes with the max).
    s = jnp.dot(patches_ref[...], wconv_ref[...],
                preferred_element_type=f32)                        # (2B*L, NN*6*C)
    tot_c = s.shape[-1]
    t_idx = jax.lax.broadcasted_iota(jnp.int32, (L, tot_c), 0)
    mask = jnp.where(t_idx < vlen_ref[...], 0.0, NEG)              # (L, NN*6*C)
    s3 = s.reshape(TB, L, tot_c) + mask[None, :, :]                # leading-dim split only
    cnn = jnp.maximum(jnp.max(s3, axis=1) + bconv_ref[...], 0.0)   # (2B, NN*6*C)

    # [2] per-node feed-forward (block-diagonal) + ReLU
    ff = jnp.dot(cnn.astype(bf16), wff_ref[...],
                 preferred_element_type=f32) + bff_ref[...]
    ff = jnp.maximum(ff, 0.0)                                      # (2B, NN*GH)

    # [3] lowerGCN: A1_hat @ (X @ W) + b   (rows reordered to (node, branch, b))
    x = jnp.concatenate([ff[:, n * GH:(n + 1) * GH] for n in range(NN)], axis=0)
    xw = jnp.dot(x.astype(bf16), wlow_ref[...], preferred_element_type=f32)
    low = jnp.dot(alow_ref[...], xw.astype(bf16),
                  preferred_element_type=f32) + blow_ref[...]      # (NN*2B, GH)

    # [4] per-group aggregate feed-forward as block weights over node->group map
    fold = jnp.concatenate([low[n * TB:(n + 1) * TB, :] for n in range(NN)], axis=1)
    gx = jnp.dot(fold.astype(bf16), wagg_ref[...],
                 preferred_element_type=f32) + bagg_ref[...]       # (2B, NG*GH)

    # [5] upperGCN + the F.relu SDNEncoder applies to the hgcn output
    gu = jnp.concatenate([gx[:, g * GH:(g + 1) * GH] for g in range(NG)], axis=0)
    gw = jnp.dot(gu.astype(bf16), wup_ref[...], preferred_element_type=f32)
    h = jnp.dot(aup_ref[...], gw.astype(bf16),
                preferred_element_type=f32) + bup_ref[...]
    h = jnp.maximum(h, 0.0)                                        # rows (group, branch, b)

    # [6] discrepancy FCs (block-diag over groups) + ReLU + lane-padded final FC
    blocks = []
    for g in range(NG):
        blocks.append(h[g * TB:g * TB + B, :])                     # branch 0, group g
        blocks.append(h[g * TB + B:(g + 1) * TB, :])               # branch 1, group g
    hcat = jnp.concatenate(blocks, axis=1)                         # (B, NG*2*GH)
    d = jnp.dot(hcat.astype(bf16), wdisc_ref[...],
                preferred_element_type=f32) + bdisc_ref[...]
    d = jnp.maximum(d, 0.0)
    out_ref[...] = jnp.dot(d.astype(bf16), wfc_ref[...],
                           preferred_element_type=f32) + bfc_ref[...]   # (B, 128)


def pallas_sdn_fused(patches, vlen, packed, a_low, a_up, *, B, L, NN, NG, GH):
    vspec = pl.BlockSpec(memory_space=pltpu.MemorySpace.VMEM)
    args = (patches, vlen,
            packed['wconv'], packed['bconv'], packed['wff'], packed['bff'],
            a_low, packed['wlow'], packed['blow'],
            packed['wagg'], packed['bagg'],
            a_up, packed['wup'], packed['bup'],
            packed['wdisc'], packed['bdisc'], packed['wfc'], packed['bfc'])
    return pl.pallas_call(
        functools.partial(_sdn_kernel, B=B, L=L, NN=NN, NG=NG, GH=GH),
        out_shape=jax.ShapeDtypeStruct((B, packed['wfc'].shape[1]), jnp.float32),
        in_specs=[vspec] * len(args),
        out_specs=vspec,
    )(*args)


# ------------------------------ glue (JAX/XLA) -------------------------------

def build_patches(x, num_nodes, window):
    # x: (num_nodes*batch, 4, window), rows batch-major node-minor (PyG graph.x),
    # so x.reshape(B, NN, 4, W)[:, n] == x[n::num_nodes] (contiguous view).
    batch = x.shape[0] // num_nodes
    xr = x.reshape(batch, num_nodes, 4, window)
    per_scale = []
    for ch, k, trim in CONV_SPECS:
        L_s = window - trim
        pad = (k - 1) // 2
        sig = jnp.pad(xr[:, :, ch, :L_s], ((0, 0), (0, 0), (pad, pad)))
        taps = jnp.stack([sig[:, :, j:j + L_s] for j in range(k)], axis=-1)   # (B,NN,L_s,k)
        per_scale.append(jnp.pad(taps, ((0, 0), (0, 0), (0, window - L_s), (0, K_PAD - k))))
    p = jnp.stack(per_scale, axis=3)                 # (B, NN, L, 6, K)
    p = jnp.transpose(p, (0, 2, 1, 3, 4))            # (B, L, NN, 6, K)
    return p.reshape(batch * window, num_nodes * 6 * K_PAD)          # rows (b, t)


def build_valid_len(num_nodes, cnn_hidden, window):
    # per conv-output column: number of valid time positions for its scale
    lens = jnp.array([window - trim for _, _, trim in CONV_SPECS], jnp.int32)   # (6,)
    col = jnp.repeat(lens, cnn_hidden)                                          # (6*C,)
    return jnp.tile(col, (num_nodes,)).reshape(1, -1)                           # (1, NN*6*C)


def ring_edge_index(n):
    idx = jnp.arange(n)
    src = jnp.concatenate([idx, (idx + 1) % n])
    dst = jnp.concatenate([(idx + 1) % n, idx])
    return jnp.stack([src, dst])


def normalized_adj(edge_index, n):
    # dense GCN adjacency with self-loops + symmetric degree normalization
    src, dst = edge_index[0], edge_index[1]
    A = jnp.zeros((n, n), jnp.float32).at[dst, src].add(1.0)
    A = A + jnp.eye(n, dtype=jnp.float32)
    deg = A.sum(axis=1)
    dinv = jnp.where(deg > 0, 1.0 / jnp.sqrt(deg), 0.0)
    return dinv[:, None] * A * dinv[None, :]


def branch_block_adj(adjs, n, batch):
    # adjs: per-branch dense (batch*n, batch*n) normalized adjacencies,
    #       original row index = b*n + i  (PyG batch order: batch-major).
    # Kernel row ordering: r = i*(NB*batch) + br*batch + b   (entity-major).
    NB = len(adjs)
    R = n * NB * batch
    r = jnp.arange(R)
    i_idx = r // (NB * batch)
    br_idx = (r // batch) % NB
    b_idx = r % batch
    orig = b_idx * n + i_idx
    out = jnp.zeros((R, R), jnp.float32)
    for br, a in enumerate(adjs):
        sel = (br_idx == br)
        block = a[orig[:, None], orig[None, :]]
        out = out + jnp.where(sel[:, None] & sel[None, :], block, 0.0)
    return out.astype(jnp.bfloat16)


# --------------------------- model forward pass ------------------------------

def sdn_encoder_forward(packed, vlen, x1, x2, a_low, a_up, *,
                        num_nodes, graph_hidden, num_groups, out_channels):
    window = x1.shape[2]
    batch = x1.shape[0] // num_nodes
    # im2col patch expansion kept in XLA glue (tiny here); both branches stacked
    # along rows so the fused kernel sees (2*B*L, NN*6*K_PAD).
    patches = jnp.concatenate([build_patches(x1, num_nodes, window),
                               build_patches(x2, num_nodes, window)],
                              axis=0).astype(jnp.bfloat16)
    out = pallas_sdn_fused(patches, vlen, packed, a_low, a_up,
                           B=batch, L=window, NN=num_nodes, NG=num_groups,
                           GH=graph_hidden)
    return out[:, :out_channels]


# ------------------------------ parameters -----------------------------------

def init_params(key, num_nodes, cnn_hidden, graph_hidden, disc_hidden,
                out_channels, group2nodes):
    num_groups = len(group2nodes)
    keys = iter(jax.random.split(key, 256))

    def lin(in_f, out_f):
        w = 0.1 * jax.random.normal(next(keys), (in_f, out_f), jnp.float32)
        b = 0.05 * jax.random.normal(next(keys), (out_f,), jnp.float32)
        return w, b

    def conv(k, c):
        w = 0.2 * jax.random.normal(next(keys), (c, 1, k), jnp.float32)   # torch Conv1d layout
        b = 0.05 * jax.random.normal(next(keys), (c,), jnp.float32)
        w_kc = jnp.zeros((K_PAD, c), jnp.float32).at[:k, :].set(w[:, 0, :].T)
        return w_kc, b

    return {
        'cnn': [[conv(3, cnn_hidden), conv(5, cnn_hidden), conv(7, cnn_hidden),
                 conv(3, cnn_hidden), conv(5, cnn_hidden), conv(7, cnn_hidden)]
                for _ in range(num_nodes)],
        'ff': [lin(6 * cnn_hidden, graph_hidden) for _ in range(num_nodes)],
        'hgcn': {'lower': lin(graph_hidden, graph_hidden),
                 'upper': lin(graph_hidden, graph_hidden),
                 'agg': {g: lin(graph_hidden * len(nodes), graph_hidden)
                         for g, nodes in group2nodes.items()}},
        'disc': [lin(2 * graph_hidden, disc_hidden) for _ in range(num_groups)],
        'fc': lin(num_groups * disc_hidden, out_channels),
    }


def pack_params(params, num_nodes, cnn_hidden, graph_hidden, disc_hidden,
                out_channels, group2nodes):
    # Pack per-node / per-scale / per-group weights into the block-(diagonal)
    # matrices the fused kernel consumes (done once, outside jit).  bf16 weights,
    # f32 (1, N) bias rows, lane-padded final FC.
    C, GH, DH, NN = cnn_hidden, graph_hidden, disc_hidden, num_nodes
    NG = len(group2nodes)
    assert list(group2nodes.keys()) == list(range(NG)), \
        "group ids must be 0..NG-1 in insertion order (matches PyTorch ModuleList indexing)"
    TOT_K, TOT_C = NN * 6 * K_PAD, NN * 6 * C

    wconv = jnp.zeros((TOT_K, TOT_C), jnp.float32)
    bconv = jnp.zeros((TOT_C,), jnp.float32)
    for n in range(NN):
        for s in range(6):
            w_kc, b = params['cnn'][n][s]
            r, c = (n * 6 + s) * K_PAD, (n * 6 + s) * C
            wconv = wconv.at[r:r + K_PAD, c:c + C].set(w_kc)
            bconv = bconv.at[c:c + C].set(b)

    wff = jnp.zeros((TOT_C, NN * GH), jnp.float32)
    bff = jnp.zeros((NN * GH,), jnp.float32)
    for n in range(NN):
        w, b = params['ff'][n]
        wff = wff.at[n * 6 * C:(n + 1) * 6 * C, n * GH:(n + 1) * GH].set(w)
        bff = bff.at[n * GH:(n + 1) * GH].set(b)

    # aggregate FFN: column block = group (dict order, as PyTorch stacks),
    # row block = node id; .add() handles overlapping group->nodes maps.
    wagg = jnp.zeros((NN * GH, NG * GH), jnp.float32)
    bagg = jnp.zeros((NG * GH,), jnp.float32)
    for col, (g, nodes) in enumerate(group2nodes.items()):
        w, b = params['hgcn']['agg'][g]                  # (len(nodes)*GH, GH)
        for p, n in enumerate(nodes):
            wagg = wagg.at[n * GH:(n + 1) * GH, col * GH:(col + 1) * GH].add(
                w[p * GH:(p + 1) * GH, :])
        bagg = bagg.at[col * GH:(col + 1) * GH].set(b)

    wdisc = jnp.zeros((NG * 2 * GH, NG * DH), jnp.float32)
    bdisc = jnp.zeros((NG * DH,), jnp.float32)
    for g in range(NG):
        w, b = params['disc'][g]
        wdisc = wdisc.at[g * 2 * GH:(g + 1) * 2 * GH, g * DH:(g + 1) * DH].set(w)
        bdisc = bdisc.at[g * DH:(g + 1) * DH].set(b)

    wlow, blow = params['hgcn']['lower']
    wup, bup = params['hgcn']['upper']
    wfc, bfc = params['fc']
    out_pad = max(OUT_PAD_LANES, out_channels)
    wfc_p = jnp.zeros((NG * DH, out_pad), jnp.float32).at[:, :out_channels].set(wfc)
    bfc_p = jnp.zeros((out_pad,), jnp.float32).at[:out_channels].set(bfc)

    bf = jnp.bfloat16
    def row(v): return v.reshape(1, -1).astype(jnp.float32)
    return dict(wconv=wconv.astype(bf), bconv=row(bconv),
                wff=wff.astype(bf), bff=row(bff),
                wlow=wlow.astype(bf), blow=row(blow),
                wagg=wagg.astype(bf), bagg=row(bagg),
                wup=wup.astype(bf), bup=row(bup),
                wdisc=wdisc.astype(bf), bdisc=row(bdisc),
                wfc=wfc_p.astype(bf), bfc=row(bfc_p))


# --------------------------------- main ---------------------------------------

if __name__ == "__main__":
    num_nodes, batch, window = 4, 2, 16
    cnn_hidden, graph_hidden, disc_hidden, out_channels = 8, 16, 8, 4
    group2nodes = {0: [0, 1], 1: [2, 3]}
    num_groups = len(group2nodes)

    key = jax.random.PRNGKey(0)
    kp, kx1, kx2 = jax.random.split(key, 3)
    params = init_params(kp, num_nodes, cnn_hidden, graph_hidden, disc_hidden,
                         out_channels, group2nodes)
    packed = pack_params(params, num_nodes, cnn_hidden, graph_hidden, disc_hidden,
                         out_channels, group2nodes)
    vlen = build_valid_len(num_nodes, cnn_hidden, window)

    # graph.x layout: rows ordered (batch-major, node-minor) so x[n::num_nodes]
    # gathers node n across the batch, exactly as the PyTorch forward assumes.
    x1 = jax.random.normal(kx1, (num_nodes * batch, 4, window), jnp.float32)
    x2 = jax.random.normal(kx2, (num_nodes * batch, 4, window), jnp.float32)

    n_graph = num_nodes * batch
    n_group = num_groups * batch
    a1 = normalized_adj(ring_edge_index(n_graph), n_graph)     # branch adjacency (graph1)
    a2 = normalized_adj(ring_edge_index(n_group), n_group)     # group-graph adjacency
    a_low = branch_block_adj([a1, a1], num_nodes, batch)       # (2*B*NN, 2*B*NN), kernel row order
    a_up = branch_block_adj([a2, a2], num_groups, batch)       # (2*B*NG, 2*B*NG)

    fwd = jax.jit(functools.partial(
        sdn_encoder_forward, num_nodes=num_nodes, graph_hidden=graph_hidden,
        num_groups=num_groups, out_channels=out_channels))
    out = jax.block_until_ready(fwd(packed, vlen, x1, x2, a_low, a_up))
    assert out.shape == (batch, out_channels), out.shape
    assert bool(jnp.all(jnp.isfinite(out)))
    print("KERNEL_OK")
</pallas_src>

<mosaic_0001>
module attributes {stable_mosaic.version = 11 : i64} {
  func.func @_sdn_kernel(%arg0: memref<64x192xbf16, #tpu.memory_space<vmem>>, %arg1: memref<1x192xi32, #tpu.memory_space<vmem>>, %arg2: memref<192x192xbf16, #tpu.memory_space<vmem>>, %arg3: memref<1x192xf32, #tpu.memory_space<vmem>>, %arg4: memref<192x64xbf16, #tpu.memory_space<vmem>>, %arg5: memref<1x64xf32, #tpu.memory_space<vmem>>, %arg6: memref<16x16xbf16, #tpu.memory_space<vmem>>, %arg7: memref<16x16xbf16, #tpu.memory_space<vmem>>, %arg8: memref<1x16xf32, #tpu.memory_space<vmem>>, %arg9: memref<64x32xbf16, #tpu.memory_space<vmem>>, %arg10: memref<1x32xf32, #tpu.memory_space<vmem>>, %arg11: memref<8x8xbf16, #tpu.memory_space<vmem>>, %arg12: memref<16x16xbf16, #tpu.memory_space<vmem>>, %arg13: memref<1x16xf32, #tpu.memory_space<vmem>>, %arg14: memref<64x16xbf16, #tpu.memory_space<vmem>>, %arg15: memref<1x16xf32, #tpu.memory_space<vmem>>, %arg16: memref<16x128xbf16, #tpu.memory_space<vmem>>, %arg17: memref<1x128xf32, #tpu.memory_space<vmem>>, %arg18: memref<2x128xf32, #tpu.memory_space<vmem>>) attributes {dimension_semantics = [], scalar_prefetch = 0 : i64, scratch_operands = 0 : i64, tpu.core_type = #tpu.core_type<tc>} {
    %c0 = arith.constant 0 : index
    %c0_0 = arith.constant 0 : index
    %0 = vector.load %arg0[%c0, %c0_0] : memref<64x192xbf16, #tpu.memory_space<vmem>>, vector<64x192xbf16>
    %c0_1 = arith.constant 0 : index
    %c0_2 = arith.constant 0 : index
    %1 = vector.load %arg2[%c0_1, %c0_2] : memref<192x192xbf16, #tpu.memory_space<vmem>>, vector<192x192xbf16>
    %cst = arith.constant dense<0.000000e+00> : vector<64x192xf32>
    %2 = tpu.matmul %0, %1, %cst {dimension_numbers = #tpu.dot_dimension_numbers<[1], [0], [0], [1], [0, 0, 1, 1], [], []>} : vector<64x192xbf16>, vector<192x192xbf16>, vector<64x192xf32> -> vector<64x192xf32>
    %3 = tpu.iota {dimensions = array<i32: 0>} : vector<16x192xi32>
    %c0_3 = arith.constant 0 : index
    %c0_4 = arith.constant 0 : index
    %4 = vector.load %arg1[%c0_3, %c0_4] : memref<1x192xi32, #tpu.memory_space<vmem>>, vector<1x192xi32>
    %5 = vector.broadcast %4 : vector<1x192xi32> to vector<16x192xi32>
    %6 = arith.cmpi slt, %3, %5 : vector<16x192xi32>
    %cst_5 = arith.constant 0.000000e+00 : f32
    %cst_6 = arith.constant -1.000000e+30 : f32
    %7 = vector.broadcast %cst_5 : f32 to vector<16x192xf32>
    %8 = vector.broadcast %cst_6 : f32 to vector<16x192xf32>
    %9 = arith.select %6, %7, %8 : vector<16x192xi1>, vector<16x192xf32>
    %10 = vector.shape_cast %2 : vector<64x192xf32> to vector<4x16x192xf32>
    %11 = vector.shape_cast %9 : vector<16x192xf32> to vector<1x16x192xf32>
    %12 = vector.broadcast %11 : vector<1x16x192xf32> to vector<4x16x192xf32>
    %13 = arith.addf %10, %12 : vector<4x16x192xf32>
    %cst_7 = arith.constant dense<0xFF800000> : vector<4x192xf32>
    %14 = vector.multi_reduction <maximumf>, %13, %cst_7 [1] : vector<4x16x192xf32> to vector<4x192xf32>
    %c0_8 = arith.constant 0 : index
    %c0_9 = arith.constant 0 : index
    %15 = vector.load %arg3[%c0_8, %c0_9] : memref<1x192xf32, #tpu.memory_space<vmem>>, vector<1x192xf32>
    %16 = vector.broadcast %15 : vector<1x192xf32> to vector<4x192xf32>
    %17 = arith.addf %14, %16 : vector<4x192xf32>
    %cst_10 = arith.constant 0.000000e+00 : f32
    %18 = vector.broadcast %cst_10 : f32 to vector<4x192xf32>
    %19 = arith.maximumf %17, %18 : vector<4x192xf32>
    %20 = arith.truncf %19 : vector<4x192xf32> to vector<4x192xbf16>
    %c0_11 = arith.constant 0 : index
    %c0_12 = arith.constant 0 : index
    %21 = vector.load %arg4[%c0_11, %c0_12] : memref<192x64xbf16, #tpu.memory_space<vmem>>, vector<192x64xbf16>
    %cst_13 = arith.constant dense<0.000000e+00> : vector<4x64xf32>
    %22 = tpu.matmul %20, %21, %cst_13 {dimension_numbers = #tpu.dot_dimension_numbers<[1], [0], [0], [1], [0, 0, 1, 1], [], []>} : vector<4x192xbf16>, vector<192x64xbf16>, vector<4x64xf32> -> vector<4x64xf32>
    %c0_14 = arith.constant 0 : index
    %c0_15 = arith.constant 0 : index
    %23 = vector.load %arg5[%c0_14, %c0_15] : memref<1x64xf32, #tpu.memory_space<vmem>>, vector<1x64xf32>
    %24 = vector.broadcast %23 : vector<1x64xf32> to vector<4x64xf32>
    %25 = arith.addf %22, %24 : vector<4x64xf32>
    %cst_16 = arith.constant 0.000000e+00 : f32
    %26 = vector.broadcast %cst_16 : f32 to vector<4x64xf32>
    %27 = arith.maximumf %25, %26 : vector<4x64xf32>
    %28 = vector.extract_strided_slice %27 {offsets = [0, 0], sizes = [4, 16], strides = [1, 1]} : vector<4x64xf32> to vector<4x16xf32>
    %29 = vector.extract_strided_slice %27 {offsets = [0, 16], sizes = [4, 16], strides = [1, 1]} : vector<4x64xf32> to vector<4x16xf32>
    %30 = vector.extract_strided_slice %27 {offsets = [0, 32], sizes = [4, 16], strides = [1, 1]} : vector<4x64xf32> to vector<4x16xf32>
    %31 = vector.extract_strided_slice %27 {offsets = [0, 48], sizes = [4, 16], strides = [1, 1]} : vector<4x64xf32> to vector<4x16xf32>
    %32 = tpu.concatenate %28, %29, %30, %31 in 0 : vector<4x16xf32>, vector<4x16xf32>, vector<4x16xf32>, vector<4x16xf32> -> vector<16x16xf32>
    %33 = arith.truncf %32 : vector<16x16xf32> to vector<16x16xbf16>
    %c0_17 = arith.constant 0 : index
    %c0_18 = arith.constant 0 : index
    %34 = vector.load %arg7[%c0_17, %c0_18] : memref<16x16xbf16, #tpu.memory_space<vmem>>, vector<16x16xbf16>
    %cst_19 = arith.constant dense<0.000000e+00> : vector<16x16xf32>
    %35 = tpu.matmul %33, %34, %cst_19 {dimension_numbers = #tpu.dot_dimension_numbers<[1], [0], [0], [1], [0, 0, 1, 1], [], []>} : vector<16x16xbf16>, vector<16x16xbf16>, vector<16x16xf32> -> vector<16x16xf32>
    %c0_20 = arith.constant 0 : index
    %c0_21 = arith.constant 0 : index
    %36 = vector.load %arg6[%c0_20, %c0_21] : memref<16x16xbf16, #tpu.memory_space<vmem>>, vector<16x16xbf16>
    %37 = arith.truncf %35 : vector<16x16xf32> to vector<16x16xbf16>
    %cst_22 = arith.constant dense<0.000000e+00> : vector<16x16xf32>
    %38 = tpu.matmul %36, %37, %cst_22 {dimension_numbers = #tpu.dot_dimension_numbers<[1], [0], [0], [1], [0, 0, 1, 1], [], []>} : vector<16x16xbf16>, vector<16x16xbf16>, vector<16x16xf32> -> vector<16x16xf32>
    %c0_23 = arith.constant 0 : index
    %c0_24 = arith.constant 0 : index
    %39 = vector.load %arg8[%c0_23, %c0_24] : memref<1x16xf32, #tpu.memory_space<vmem>>, vector<1x16xf32>
    %40 = vector.broadcast %39 : vector<1x16xf32> to vector<16x16xf32>
    %41 = arith.addf %38, %40 : vector<16x16xf32>
    %42 = vector.extract_strided_slice %41 {offsets = [0, 0], sizes = [4, 16], strides = [1, 1]} : vector<16x16xf32> to vector<4x16xf32>
    %43 = vector.extract_strided_slice %41 {offsets = [4, 0], sizes = [4, 16], strides = [1, 1]} : vector<16x16xf32> to vector<4x16xf32>
    %44 = vector.extract_strided_slice %41 {offsets = [8, 0], sizes = [4, 16], strides = [1, 1]} : vector<16x16xf32> to vector<4x16xf32>
    %45 = vector.extract_strided_slice %41 {offsets = [12, 0], sizes = [4, 16], strides = [1, 1]} : vector<16x16xf32> to vector<4x16xf32>
    %46 = tpu.concatenate %42, %43, %44, %45 in 1 : vector<4x16xf32>, vector<4x16xf32>, vector<4x16xf32>, vector<4x16xf32> -> vector<4x64xf32>
    %47 = arith.truncf %46 : vector<4x64xf32> to vector<4x64xbf16>
    %c0_25 = arith.constant 0 : index
    %c0_26 = arith.constant 0 : index
    %48 = vector.load %arg9[%c0_25, %c0_26] : memref<64x32xbf16, #tpu.memory_space<vmem>>, vector<64x32xbf16>
    %cst_27 = arith.constant dense<0.000000e+00> : vector<4x32xf32>
    %49 = tpu.matmul %47, %48, %cst_27 {dimension_numbers = #tpu.dot_dimension_numbers<[1], [0], [0], [1], [0, 0, 1, 1], [], []>} : vector<4x64xbf16>, vector<64x32xbf16>, vector<4x32xf32> -> vector<4x32xf32>
    %c0_28 = arith.constant 0 : index
    %c0_29 = arith.constant 0 : index
    %50 = vector.load %arg10[%c0_28, %c0_29] : memref<1x32xf32, #tpu.memory_space<vmem>>, vector<1x32xf32>
    %51 = vector.broadcast %50 : vector<1x32xf32> to vector<4x32xf32>
    %52 = arith.addf %49, %51 : vector<4x32xf32>
    %53 = vector.extract_strided_slice %52 {offsets = [0, 0], sizes = [4, 16], strides = [1, 1]} : vector<4x32xf32> to vector<4x16xf32>
    %54 = vector.extract_strided_slice %52 {offsets = [0, 16], sizes = [4, 16], strides = [1, 1]} : vector<4x32xf32> to vector<4x16xf32>
    %55 = tpu.concatenate %53, %54 in 0 : vector<4x16xf32>, vector<4x16xf32> -> vector<8x16xf32>
    %56 = arith.truncf %55 : vector<8x16xf32> to vector<8x16xbf16>
    %c0_30 = arith.constant 0 : index
    %c0_31 = arith.constant 0 : index
    %57 = vector.load %arg12[%c0_30, %c0_31] : memref<16x16xbf16, #tpu.memory_space<vmem>>, vector<16x16xbf16>
    %cst_32 = arith.constant dense<0.000000e+00> : vector<8x16xf32>
    %58 = tpu.matmul %56, %57, %cst_32 {dimension_numbers = #tpu.dot_dimension_numbers<[1], [0], [0], [1], [0, 0, 1, 1], [], []>} : vector<8x16xbf16>, vector<16x16xbf16>, vector<8x16xf32> -> vector<8x16xf32>
    %c0_33 = arith.constant 0 : index
    %c0_34 = arith.constant 0 : index
    %59 = vector.load %arg11[%c0_33, %c0_34] : memref<8x8xbf16, #tpu.memory_space<vmem>>, vector<8x8xbf16>
    %60 = arith.truncf %58 : vector<8x16xf32> to vector<8x16xbf16>
    %cst_35 = arith.constant dense<0.000000e+00> : vector<8x16xf32>
    %61 = tpu.matmul %59, %60, %cst_35 {dimension_numbers = #tpu.dot_dimension_numbers<[1], [0], [0], [1], [0, 0, 1, 1], [], []>} : vector<8x8xbf16>, vector<8x16xbf16>, vector<8x16xf32> -> vector<8x16xf32>
    %c0_36 = arith.constant 0 : index
    %c0_37 = arith.constant 0 : index
    %62 = vector.load %arg13[%c0_36, %c0_37] : memref<1x16xf32, #tpu.memory_space<vmem>>, vector<1x16xf32>
    %63 = vector.broadcast %62 : vector<1x16xf32> to vector<8x16xf32>
    %64 = arith.addf %61, %63 : vector<8x16xf32>
    %cst_38 = arith.constant 0.000000e+00 : f32
    %65 = vector.broadcast %cst_38 : f32 to vector<8x16xf32>
    %66 = arith.maximumf %64, %65 : vector<8x16xf32>
    %67 = vector.extract_strided_slice %66 {offsets = [0, 0], sizes = [2, 16], strides = [1, 1]} : vector<8x16xf32> to vector<2x16xf32>
    %68 = vector.extract_strided_slice %66 {offsets = [2, 0], sizes = [2, 16], strides = [1, 1]} : vector<8x16xf32> to vector<2x16xf32>
    %69 = vector.extract_strided_slice %66 {offsets = [4, 0], sizes = [2, 16], strides = [1, 1]} : vector<8x16xf32> to vector<2x16xf32>
    %70 = vector.extract_strided_slice %66 {offsets = [6, 0], sizes = [2, 16], strides = [1, 1]} : vector<8x16xf32> to vector<2x16xf32>
    %71 = tpu.concatenate %67, %68, %69, %70 in 1 : vector<2x16xf32>, vector<2x16xf32>, vector<2x16xf32>, vector<2x16xf32> -> vector<2x64xf32>
    %72 = arith.truncf %71 : vector<2x64xf32> to vector<2x64xbf16>
    %c0_39 = arith.constant 0 : index
    %c0_40 = arith.constant 0 : index
    %73 = vector.load %arg14[%c0_39, %c0_40] : memref<64x16xbf16, #tpu.memory_space<vmem>>, vector<64x16xbf16>
    %cst_41 = arith.constant dense<0.000000e+00> : vector<2x16xf32>
    %74 = tpu.matmul %72, %73, %cst_41 {dimension_numbers = #tpu.dot_dimension_numbers<[1], [0], [0], [1], [0, 0, 1, 1], [], []>} : vector<2x64xbf16>, vector<64x16xbf16>, vector<2x16xf32> -> vector<2x16xf32>
    %c0_42 = arith.constant 0 : index
    %c0_43 = arith.constant 0 : index
    %75 = vector.load %arg15[%c0_42, %c0_43] : memref<1x16xf32, #tpu.memory_space<vmem>>, vector<1x16xf32>
    %76 = vector.broadcast %75 : vector<1x16xf32> to vector<2x16xf32>
    %77 = arith.addf %74, %76 : vector<2x16xf32>
    %cst_44 = arith.constant 0.000000e+00 : f32
    %78 = vector.broadcast %cst_44 : f32 to vector<2x16xf32>
    %79 = arith.maximumf %77, %78 : vector<2x16xf32>
    %80 = arith.truncf %79 : vector<2x16xf32> to vector<2x16xbf16>
    %c0_45 = arith.constant 0 : index
    %c0_46 = arith.constant 0 : index
    %81 = vector.load %arg16[%c0_45, %c0_46] : memref<16x128xbf16, #tpu.memory_space<vmem>>, vector<16x128xbf16>
    %cst_47 = arith.constant dense<0.000000e+00> : vector<2x128xf32>
    %82 = tpu.matmul %80, %81, %cst_47 {dimension_numbers = #tpu.dot_dimension_numbers<[1], [0], [0], [1], [0, 0, 1, 1], [], []>} : vector<2x16xbf16>, vector<16x128xbf16>, vector<2x128xf32> -> vector<2x128xf32>
    %c0_48 = arith.constant 0 : index
    %c0_49 = arith.constant 0 : index
    %83 = vector.load %arg17[%c0_48, %c0_49] : memref<1x128xf32, #tpu.memory_space<vmem>>, vector<1x128xf32>
    %84 = vector.broadcast %83 : vector<1x128xf32> to vector<2x128xf32>
    %85 = arith.addf %82, %84 : vector<2x128xf32>
    %c0_50 = arith.constant 0 : index
    %c0_51 = arith.constant 0 : index
    %86 = vector.load %arg18[%c0_50, %c0_51] : memref<2x128xf32, #tpu.memory_space<vmem>>, vector<2x128xf32>
    tpu.vector_store %arg18[%c0_50, %c0_51], %85 {strides = array<i32>} : memref<2x128xf32, #tpu.memory_space<vmem>>, vector<2x128xf32>,
    return
  }
}

</mosaic_0001>

<bundles_post_ra>
// kernel: sdn_encoder_forward.1
= control target key start
LH: loop header
LB: loop body
LE: loop exit
PB: predicated region body
PF: predicated region fallthrough
CT: control target
= control target key end

     0   :  { %s1817_s0 = inlined_call_operand.vmem [shape: bf16[64,192], index: 0, kind: input, shape index: {}]   ;;  %s1818_s1 = inlined_call_operand.vmem [shape: s32[1,192], index: 1, kind: input, shape index: {}]   ;;  %s1819_s2 = inlined_call_operand.vmem [shape: bf16[192,192], index: 2, kind: input, shape index: {}]   ;;  %s1820_s3 = inlined_call_operand.vmem [shape: f32[1,192], index: 3, kind: input, shape index: {}]   ;;  %s1821_s4 = inlined_call_operand.vmem [shape: bf16[192,64], index: 4, kind: input, shape index: {}]   ;;  %s1822_s5 = inlined_call_operand.vmem [shape: f32[1,64], index: 5, kind: input, shape index: {}]   ;;  %s1823_s6 = inlined_call_operand.vmem [shape: bf16[16,16], index: 6, kind: input, shape index: {}]   ;;  %s1824_s7 = inlined_call_operand.vmem [shape: bf16[16,16], index: 7, kind: input, shape index: {}]   ;;  %s1825_s8 = inlined_call_operand.vmem [shape: f32[1,16], index: 8, kind: input, shape index: {}]   ;;  %s1826_s9 = inlined_call_operand.vmem [shape: bf16[64,32], index: 9, kind: input, shape index: {}]   ;;  %s1827_s10 = inlined_call_operand.vmem [shape: f32[1,32], index: 10, kind: input, shape index: {}]   ;;  %s1828_s11 = inlined_call_operand.vmem [shape: bf16[8,8], index: 11, kind: input, shape index: {}]   ;;  %s1829_s12 = inlined_call_operand.vmem [shape: bf16[16,16], index: 12, kind: input, shape index: {}]   ;;  %s1830_s13 = inlined_call_operand.vmem [shape: f32[1,16], index: 13, kind: input, shape index: {}]   ;;  %s1831_s14 = inlined_call_operand.vmem [shape: bf16[64,16], index: 14, kind: input, shape index: {}]   ;;  %s1832_s15 = inlined_call_operand.vmem [shape: f32[1,16], index: 15, kind: input, shape index: {}]   ;;  %s1833_s16 = inlined_call_operand.vmem [shape: bf16[16,128], index: 16, kind: input, shape index: {}]   ;;  %s1834_s17 = inlined_call_operand.vmem [shape: f32[1,128], index: 17, kind: input, shape index: {}]   ;;  %s1835_s18 = inlined_call_operand.hbm [shape: f32[2,128], index: 18, kind: output, shape index: {}]  }
   0x1   :  { %1838 = sst [smem:[#allocation5_spill]] %s1817_s0 }
   0x2   :  { %1839 = sst [smem:[#allocation6_spill]] %s1818_s1 }
   0x3   :  { %1840 = sst [smem:[#allocation7_spill]] %s1819_s2 }
   0x4   :  { %s1841_s29 = sld [smem:[#allocation7_spill]]  ;;  %vm249_vm0 = vcmask 523264  }
   0x5   :  { %s1842_s23 = sld [smem:[#allocation5_spill]] }
   0xa   :  { %v1328_v0 = vld [vmem:[%s1841_s29 + $0x74] ss:$8 sps:$4 sm:$0xff]   ;;  %v1330_v1 = vld [vmem:[%s1841_s29 + $0x70] ss:$8 sps:$4 sm:$0xff]   ;;  %v1331_v2 = vld [vmem:[%s1841_s29 + $0x64] ss:$8 sps:$4 sm:$0xff]  }
   0xb   :  { %262 = vmatprep.subr.bf16.mxu0 %v1328_v0  ;;  %v1333_v3 = vld [vmem:[%s1841_s29 + $0x60] ss:$8 sps:$4 sm:$0xff]   ;;  %v1334_v4 = vld [vmem:[%s1841_s29 + $0x54] ss:$8 sps:$4 sm:$0xff]   ;;  %v1336_v5 = vld [vmem:[%s1841_s29 + $0x50] ss:$8 sps:$4 sm:$0xff]  }
   0xc   :  { %263 = vmatpush1.bf16.msra.mxu0 %v1330_v1  ;;  %v1337_v6 = vld [vmem:[%s1841_s29 + $0x44] ss:$8 sps:$4 sm:$0xff]   ;;  %v1339_v7 = vld [vmem:[%s1841_s29 + $0x40] ss:$8 sps:$4 sm:$0xff]   ;;  %v1340_v8 = vld [vmem:[%s1841_s29 + $0x34] ss:$8 sps:$4 sm:$0xff]  }
   0xd   :  { %264 = vmatprep.subr.bf16.mxu0 %v1331_v2  ;;  %v1342_v9 = vld [vmem:[%s1841_s29 + $0x30] ss:$8 sps:$4 sm:$0xff]   ;;  %v1343_v10 = vld [vmem:[%s1841_s29 + $0x24] ss:$8 sps:$4 sm:$0xff]   ;;  %v1345_v12 = vld [vmem:[%s1841_s29 + $0x20] ss:$8 sps:$4 sm:$0xff]  }
   0xe   :  { %v1366_v11 = vld [vmem:[%s1842_s23 + $0x4] ss:$8 sps:$4 sm:$0xff]   ;;  %v1346_v13 = vld [vmem:[%s1841_s29 + $0x14] ss:$8 sps:$4 sm:$0xff]   ;;  %v1348_v14 = vld [vmem:[%s1841_s29 + $0x10] ss:$8 sps:$4 sm:$0xff]  }
   0xf   :  { %1201 = vmatprep.mubr.msk.bf16.mxu0 %vm249_vm0, %v1366_v11  ;;  %v1349_v15 = vld [vmem:[%s1841_s29 + $0x4] ss:$8 sps:$4 sm:$0xff]   ;;  %v1351_v16 = vld [vmem:[%s1841_s29] ss:$8 sps:$4 sm:$0xff]   ;;  %v1352_v17 = vld [vmem:[%s1841_s29 + $0xb4] ss:$8 sps:$4 sm:$0xff]  }
  0x10   :  { %265 = vmatpush1.bf16.msra.mxu0 %v1333_v3  ;;  %v1354_v18 = vld [vmem:[%s1841_s29 + $0xb0] ss:$8 sps:$4 sm:$0xff]   ;;  %v1355_v19 = vld [vmem:[%s1841_s29 + $0xa4] ss:$8 sps:$4 sm:$0xff]   ;;  %v1357_v20 = vld [vmem:[%s1841_s29 + $0xa0] ss:$8 sps:$4 sm:$0xff]  }
  0x11   :  { %266 = vmatprep.subr.bf16.mxu0 %v1334_v4  ;;  %v1358_v21 = vld [vmem:[%s1841_s29 + $0x94] ss:$8 sps:$4 sm:$0xff]  }
  0x14   :  { %267 = vmatpush1.bf16.msra.mxu0 %v1336_v5 }
  0x15   :  { %268 = vmatprep.subr.bf16.mxu0 %v1337_v6 }
  0x18   :  { %269 = vmatpush1.bf16.msra.mxu0 %v1339_v7 }
  0x19   :  { %270 = vmatprep.subr.bf16.mxu0 %v1340_v8 }
  0x1c   :  { %271 = vmatpush1.bf16.msra.mxu0 %v1342_v9 }
  0x1d   :  { %272 = vmatprep.subr.bf16.mxu0 %v1343_v10 }
  0x20   :  { %273 = vmatpush1.bf16.msra.mxu0 %v1345_v12 }
  0x21   :  { %274 = vmatprep.subr.bf16.mxu0 %v1346_v13 }
  0x24   :  { %275 = vmatpush1.bf16.msra.mxu0 %v1348_v14 }
  0x25   :  { %276 = vmatprep.subr.bf16.mxu0 %v1349_v15 }
  0x28   :  { %277 = vmatpush1.bf16.msra.mxu0 %v1351_v16 }
  0x29   :  { %286 = vmatprep.subr.bf16.mxu0 %v1352_v17 }
  0x2c   :  { %287 = vmatpush2.bf16.msra.mxu0 %v1354_v18 }
  0x2d   :  { %288 = vmatprep.subr.bf16.mxu0 %v1355_v19 }
  0x2e   :  { %23 = vsyncpa [#allocation3], 0  ;;  %v1360_v22 = vld [vmem:[%s1841_s29 + $0x90] ss:$8 sps:$4 sm:$0xff]   ;;  %v1361_v23 = vld [vmem:[%s1841_s29 + $0x84] ss:$8 sps:$4 sm:$0xff]   ;;  %v335_v45 = vlaneseq }
  0x2f   :  { %v1363_v24 = vld [vmem:[%s1841_s29 + $0x80] ss:$8 sps:$4 sm:$0xff]   ;;  %v1367_v26 = vld [vmem:[%s1842_s23 + $0x14] ss:$8 sps:$4 sm:$0xff]   ;;  %v1369_v27 = vld [vmem:[%s1842_s23 + $0x10] ss:$8 sps:$4 sm:$0xff]  }
  0x30   :  { %289 = vmatpush2.bf16.msra.mxu0 %v1357_v20  ;;  %v1364_v25 = vld [vmem:[%s1842_s23] ss:$8 sps:$4 sm:$0xff]   ;;  %v1370_v28 = vld [vmem:[%s1842_s23 + $0x24] ss:$8 sps:$4 sm:$0xff]   ;;  %v1373_v30 = vld [vmem:[%s1842_s23 + $0x34] ss:$8 sps:$4 sm:$0xff]  }
  0x31   :  { %290 = vmatprep.subr.bf16.mxu0 %v1358_v21  ;;  %v1372_v29 = vld [vmem:[%s1842_s23 + $0x20] ss:$8 sps:$4 sm:$0xff]   ;;  %v1375_v31 = vld [vmem:[%s1842_s23 + $0x30] ss:$8 sps:$4 sm:$0xff]   ;;  %v1422_v33 = vmov 0   ;;  %v1664_v46 = vshrl.u32 %v335_v45, 7 }
  0x32   :  { %v1376_v32 = vld [vmem:[%s1821_s4 + $0x38] sm:$0xff]   ;;  %611 = vmatprep.subr.bf16.mxu1 %v1422_v33  ;;  %v1377_v34 = vld [vmem:[%s1821_s4 + $0x30] sm:$0xff]   ;;  %v1378_v35 = vld [vmem:[%s1821_s4 + $0x28] sm:$0xff]   ;;  %s1843_s20 = sld [smem:[#allocation6_spill]]  ;;  %v1423_v56 = vmov -1e+30  }
  0x33   :  { %612 = vmatpush1.bf16.msra.mxu1 %v1376_v32  ;;  %v1379_v36 = vld [vmem:[%s1821_s4 + $0x20] sm:$0xff]   ;;  %v1380_v37 = vld [vmem:[%s1821_s4 + $0x18] sm:$0xff]   ;;  %v1381_v38 = vld [vmem:[%s1821_s4 + $0x10] sm:$0xff]   ;;  %v345_v47 = vsub.s32 1, %v1664_v46  ;;  %v341_v48 = vsub.s32 0, %v1664_v46  ;;  %v337_v50 = vadd.s32 8, %v1664_v46 }
  0x34   :  { %291 = vmatpush2.bf16.msra.mxu0 %v1360_v22  ;;  %613 = vmatprep.subr.bf16.mxu1 %v1422_v33  ;;  %v1382_v39 = vld [vmem:[%s1821_s4 + $0x8] sm:$0xff]   ;;  %v1383_v40 = vld [vmem:[%s1821_s4] sm:$0xff]   ;;  %v1384_v41 = vld [vmem:[%s1821_s4 + $0x58] sm:$0xff]   ;;  %vm519_vm5 = vcmask 1041409   ;;  %vm522_vm6 = vcmask 1042434   ;;  %vm525_vm7 = vcmask 1043459  }
  0x35   :  { %292 = vmatprep.subr.bf16.mxu0 %v1361_v23  ;;  %v1385_v42 = vld [vmem:[%s1821_s4 + $0x50] sm:$0xff]   ;;  %v1386_v43 = vld [vmem:[%s1821_s4 + $0x48] sm:$0xff]   ;;  %v1387_v44 = vld [vmem:[%s1821_s4 + $0x40] sm:$0xff]   ;;  %vm1425_vm8 = vmmov 0   ;;  %s1428_s25 = smov 96   ;;  %vm663_vm9 = vcmask 1043456  }
  0x36   :  { %vm675_vm10 = vcmask 130048   ;;  %s1429_s21 = smov 16   ;;  %vm793_vm11 = vcmask 261120   ;;  %vm795_vm12 = vcmask 392192   ;;  %vm947_vm13 = vcmask 64512  }
  0x37   :  { %614 = vmatpush1.bf16.msra.mxu1 %v1377_v34 }
  0x38   :  { %293 = vmatpush2.bf16.msra.mxu0 %v1363_v24  ;;  %615 = vmatprep.subr.bf16.mxu1 %v1422_v33  ;;  %v338_v49 = vld [vmem:[%s1843_s20] sm:$0x3]  ;;  %s1432_s20 = smov [#allocation2]  }
  0x39   :  { %v346_v51 = vrot.slane %v338_v49, %v345_v47  ;;  %v342_v53 = vrot.slane %v338_v49, %v341_v48 }
  0x3b   :  { %295 = vmatmul.mubr.bf16.vlgmr.msra.gmra.mxu0 %v1364_v25  ;;  %616 = vmatpush1.bf16.msra.mxu1 %v1378_v35  ;;  %vm350_vm1 = vcmp.lt.s32.totalorder %v337_v50, %v346_v51  ;;  %vm349_vm2 = vcmp.lt.s32.totalorder %v337_v50, %v342_v53  ;;  %vm348_vm3 = vcmp.lt.s32.totalorder %v1664_v46, %v346_v51 }
  0x3c   :  { %1202 = vmatprep.mubr.msk.bf16.mxu0 %vm249_vm0, %v1367_v26  ;;  %617 = vmatprep.subr.bf16.mxu1 %v1422_v33  ;;  %vm347_vm4 = vcmp.lt.s32.totalorder %v1664_v46, %v342_v53  ;;  %v1678_v57 = vsel %vm350_vm1, 0.0, %v1423_v56  ;;  %v1680_v58 = vsel %vm349_vm2, 0.0, %v1423_v56  ;;  %v352_v59 = vsel %vm348_vm3, 0.0, %v1423_v56 }
  0x3d   :  { %v351_v61 = vsel %vm347_vm4, 0.0, %v1423_v56  ;;  %v435_v56 = vld [vmem:[%s1820_s3] sm:$0x3]  ;;  %s1430_s3 = smov 32  }
  0x3f   :  { %618 = vmatpush1.bf16.msra.mxu1 %v1379_v36 }
  0x40   :  { %619 = vmatprep.subr.bf16.mxu1 %v1422_v33 }
  0x43   :  { %305 = vmatmul.mubr.bf16.gmra.mxu0 %v1369_v27  ;;  %620 = vmatpush1.bf16.msra.mxu1 %v1380_v37 }
  0x44   :  { %1203 = vmatprep.mubr.msk.bf16.mxu0 %vm249_vm0, %v1370_v28  ;;  %621 = vmatprep.subr.bf16.mxu1 %v1422_v33 }
  0x47   :  { %622 = vmatpush1.bf16.msra.mxu1 %v1381_v38 }
  0x48   :  { %623 = vmatprep.subr.bf16.mxu1 %v1422_v33 }
  0x4b   :  { %315 = vmatmul.mubr.bf16.gmra.mxu0 %v1372_v29  ;;  %624 = vmatpush1.bf16.msra.mxu1 %v1382_v39 }
  0x4c   :  { %1204 = vmatprep.mubr.msk.bf16.mxu0 %vm249_vm0, %v1373_v30  ;;  %625 = vmatprep.subr.bf16.mxu1 %v1422_v33 }
  0x4f   :  { %626 = vmatpush1.bf16.msra.mxu1 %v1383_v40 }
  0x50   :  { %635 = vmatprep.subr.bf16.mxu1 %v1422_v33 }
  0x53   :  { %325 = vmatmul.mubr.bf16.gmra.mxu0 %v1375_v31  ;;  %636 = vmatpush2.bf16.msra.mxu1 %v1384_v41 }
  0x54   :  { %637 = vmatprep.subr.bf16.mxu1 %v1422_v33 }
  0x57   :  { %638 = vmatpush2.bf16.msra.mxu1 %v1385_v42 }
  0x58   :  { %639 = vmatprep.subr.bf16.mxu1 %v1422_v33 }
  0x5b   :  { %640 = vmatpush2.bf16.msra.mxu1 %v1386_v43 }
  0x5c   :  { %641 = vmatprep.subr.bf16.mxu1 %v1422_v33 }
  0x5f   :  { %642 = vmatpush2.bf16.msra.mxu1 %v1387_v44 }
  0xfb   :  { %v296_v52 = vpop.f32.mrf.mxu0 }
  0xfc   :  { %v355_v2 = vadd.f32 %v351_v61, %v296_v52 }
  0xfd   :  { %v298_v54 = vpop.f32.mrf.mxu0 }
  0xfe   :  { %v356_v1 = vadd.f32 %v352_v59, %v298_v54 }
  0xff   :  { %v300_v55 = vpop.f32.mrf.mxu0 }
 0x100   :  { %v357_v63 = vadd.f32 %v1680_v58, %v300_v55  ;;  %v378_v7 = vsel %vm249_vm0, %v356_v1, -inf }
 0x101   :  { %v302_v60 = vpop.f32.mrf.mxu0 }
 0x102   :  { %v358_v62 = vadd.f32 %v1678_v57, %v302_v60  ;;  %v371_v5 = vmax.f32 %v355_v2, %v357_v63 }
 0x103   :  { %v306_v0 = vpop.f32.mrf.mxu0 }
 0x104   :  { %v379_v4 = vsel %vm249_vm0, %v358_v62, -inf  ;;  %v359_v8 = vadd.f32 %v351_v61, %v306_v0  ;;  %v372_v15 = vrot.slane %v371_v5, 4 }
 0x105   :  { %v308_v3 = vpop.f32.mrf.mxu0  ;;  %v380_v11 = vmax.f32 %v378_v7, %v379_v4 }
 0x106   :  { %v360_v9 = vadd.f32 %v352_v59, %v308_v3  ;;  %v373_v24 = vmax.f32 %v371_v5, %v372_v15 }
 0x107   :  { %v310_v6 = vpop.f32.mrf.mxu0  ;;  %v381_v20 = vrot.slane %v380_v11, 4 }
 0x108   :  { %v361_v10 = vadd.f32 %v1680_v58, %v310_v6  ;;  %v394_v17 = vsel %vm249_vm0, %v360_v9, -inf  ;;  %v374_v37 = vrot.slane %v373_v24, 2 }
 0x109   :  { %v312_v12 = vpop.f32.mrf.mxu0  ;;  %v382_v31 = vmax.f32 %v380_v11, %v381_v20 }
 0x10a   :  { %v387_v13 = vmax.f32 %v359_v8, %v361_v10  ;;  %v362_v14 = vadd.f32 %v1678_v57, %v312_v12  ;;  %v375_v52 = vmax.f32 %v373_v24, %v374_v37  ;;  %v440_v8 = vrot.slane %v435_v56, %v341_v48 }
 0x10b   :  { %v316_v16 = vpop.f32.mrf.mxu0  ;;  %v383_v43 = vrot.slane %v382_v31, 2 }
 0x10c   :  { %v388_v18 = vrot.slane %v387_v13, 4  ;;  %v395_v19 = vsel %vm249_vm0, %v362_v14, -inf  ;;  %v363_v28 = vadd.f32 %v351_v61, %v316_v16  ;;  %v376_v9 = vrot.slane %v375_v52, 1 }
 0x10d   :  { %v396_v21 = vmax.f32 %v394_v17, %v395_v19  ;;  %v318_v22 = vpop.f32.mrf.mxu0  ;;  %v384_v1 = vmax.f32 %v382_v31, %v383_v43 }
 0x10e   :  { %v389_v23 = vmax.f32 %v387_v13, %v388_v18  ;;  %v364_v29 = vadd.f32 %v352_v59, %v318_v22  ;;  %v444_v13 = vrot.slane %v435_v56, %v345_v47 }
 0x10f   :  { %v397_v25 = vrot.slane %v396_v21, 4  ;;  %v320_v26 = vpop.f32.mrf.mxu0  ;;  %v385_v14 = vrot.slane %v384_v1, 1 }
 0x110   :  { %v390_v27 = vrot.slane %v389_v23, 2  ;;  %v365_v30 = vadd.f32 %v1680_v58, %v320_v26  ;;  %v410_v40 = vsel %vm249_vm0, %v364_v29, -inf }
 0x111   :  { %v398_v32 = vmax.f32 %v396_v21, %v397_v25  ;;  %v322_v33 = vpop.f32.mrf.mxu0  ;;  %v377_v21 = vmax.f32 %v375_v52, %v376_v9  ;;  %v386_v24 = vmax.f32 %v384_v1, %v385_v14 }
 0x112   :  { %v391_v34 = vmax.f32 %v389_v23, %v390_v27  ;;  %v403_v35 = vmax.f32 %v363_v28, %v365_v30  ;;  %v366_v36 = vadd.f32 %v1678_v57, %v322_v33 }
 0x113   :  { %v399_v38 = vrot.slane %v398_v32, 2  ;;  %v326_v39 = vpop.f32.mrf.mxu0  ;;  %v447_v31 = vadd.f32 %v440_v8, %v377_v21  ;;  %v448_v33 = vadd.f32 %v444_v13, %v386_v24 }
 0x114   :  { %v404_v41 = vrot.slane %v403_v35, 4  ;;  %v411_v42 = vsel %vm249_vm0, %v366_v36, -inf  ;;  %v392_v50 = vrot.slane %v391_v34, 1  ;;  %v367_v62 = vadd.f32 %v351_v61, %v326_v39 }
 0x115   :  { %v400_v44 = vmax.f32 %v398_v32, %v399_v38  ;;  %v412_v45 = vmax.f32 %v410_v40, %v411_v42  ;;  %v328_v49 = vpop.f32.mrf.mxu0 }
 0x116   :  { %v405_v51 = vmax.f32 %v403_v35, %v404_v41  ;;  %v368_v63 = vadd.f32 %v352_v59, %v328_v49  ;;  %v393_v4 = vmax.f32 %v391_v34, %v392_v50  ;;  %v455_v41 = vmax.f32 %v447_v31, 0.0 }
 0x117   :  { %v401_v53 = vrot.slane %v400_v44, 1  ;;  %v413_v54 = vrot.slane %v412_v45, 4  ;;  %v330_v55 = vpop.f32.mrf.mxu0 }
 0x118   :  { %v406_v60 = vrot.slane %v405_v51, 2  ;;  %v369_v0 = vadd.f32 %v1680_v58, %v330_v55  ;;  %v426_v61 = vsel %vm249_vm0, %v368_v63, -inf  ;;  %v449_v17 = vadd.f32 %v440_v8, %v393_v4 }
 0x119   :  { %v414_v2 = vmax.f32 %v412_v45, %v413_v54  ;;  %v332_v3 = vpop.f32.mrf.mxu0  ;;  %v402_v10 = vmax.f32 %v400_v44, %v401_v53  ;;  %v456_v45 = vmax.f32 %v448_v33, 0.0  ;;  %v463_v54 = vpack.c.bf16 %v455_v41, %v455_v41  ;;  %v1390_v33 = vld [vmem:[%s1826_s9 + $0x18] sm:$0xff]  }
 0x11a   :  { %v407_v5 = vmax.f32 %v405_v51, %v406_v60  ;;  %v419_v6 = vmax.f32 %v367_v62, %v369_v0  ;;  %v370_v7 = vadd.f32 %v1678_v57, %v332_v3  ;;  %v457_v27 = vmax.f32 %v449_v17, 0.0  ;;  %v1205_v17 = vld [vmem:[%s1822_s5] ss:$0 sm:$0xff]  ;;  %s1427_s5 = smov 112  }
 0x11b   :  { %v415_v11 = vrot.slane %v414_v2, 2  ;;  %v450_v19 = vadd.f32 %v444_v13, %v402_v10  ;;  %v464_v62 = vpack.c.bf16 %v456_v45, %v456_v45  ;;  %v510_v4 = vunpack.c.l.b16 %v463_v54 }
 0x11c   :  { %v408_v12 = vrot.slane %v407_v5, 1  ;;  %v420_v59 = vrot.slane %v419_v6, 4  ;;  %v427_v58 = vsel %vm249_vm0, %v370_v7, -inf  ;;  %v465_v36 = vpack.c.bf16 %v457_v27, %v457_v27 }
 0x11d   :  { %v416_v15 = vmax.f32 %v414_v2, %v415_v11  ;;  %v428_v16 = vmax.f32 %v426_v61, %v427_v58  ;;  %v458_v29 = vmax.f32 %v450_v19, 0.0  ;;  %v511_v7 = vunpack.c.l.b16 %v464_v62 }
 0x11e   :  { %v409_v57 = vmax.f32 %v407_v5, %v408_v12  ;;  %v421_v18 = vmax.f32 %v419_v6, %v420_v59  ;;  %v512_v49 = vunpack.c.l.b16 %v465_v36  ;;  %v1393_v36 = vld [vmem:[%s1826_s9] sm:$0xff]  }
 0x11f   :  { %v417_v48 = vrot.slane %v416_v15, 1  ;;  %v429_v20 = vrot.slane %v428_v16, 4  ;;  %v466_v40 = vpack.c.bf16 %v458_v29, %v458_v29 }
 0x120   :  { %v451_v22 = vadd.f32 %v440_v8, %v409_v57  ;;  %v422_v23 = vrot.slane %v421_v18, 2  ;;  %v518_v63 = vrot.slane %v512_v49, 7 }
 0x121   :  { %v418_v25 = vmax.f32 %v416_v15, %v417_v48  ;;  %v430_v26 = vmax.f32 %v428_v16, %v429_v20  ;;  %v513_v52 = vunpack.c.l.b16 %v466_v40  ;;  %v1424_v15 = vmov 0.0   ;;  %v1388_v16 = vld [vmem:[%s1824_s7] sm:$0xff]   ;;  %s1426_s7 = smov 80  }
 0x122   :  { %v423_v28 = vmax.f32 %v421_v18, %v422_v23  ;;  %v459_v46 = vmax.f32 %v451_v22, 0.0  ;;  %v520_v9 = vsel %vm519_vm5, %v518_v63, %v510_v4  ;;  %1263 = vmatprep.subr.bf16.mxu1 %v1424_v15  ;;  %1275 = vmatprep.subr.bf16.mxu0 %v1424_v15 }
 0x123   :  { %v431_v47 = vrot.slane %v430_v26, 2  ;;  %v452_v30 = vadd.f32 %v444_v13, %v418_v25  ;;  %v527_v2 = vrot.slane %v513_v52, 7  ;;  %1283 = vmatprep.mubr.msk.bf16.mxu0 %vm1425_vm8, %v1424_v15  ;;  %1276 = vmatpush3.bf16.msra.mxu0 %v1390_v33 }
 0x124   :  { %v424_v32 = vrot.slane %v423_v28, 1  ;;  %v467_v38 = vpack.c.bf16 %v459_v46, %v459_v46  ;;  %1277 = vmatprep.subr.bf16.mxu0 %v1424_v15 }
 0x125   :  { %v432_v34 = vmax.f32 %v430_v26, %v431_v47  ;;  %v460_v35 = vmax.f32 %v452_v30, 0.0  ;;  %v528_v10 = vsel %vm519_vm5, %v527_v2, %v511_v7 }
 0x126   :  { %v425_v37 = vmax.f32 %v423_v28, %v424_v32  ;;  %v514_v53 = vunpack.c.l.b16 %v467_v38  ;;  %v1389_v32 = vld [vmem:[%s1823_s6] sm:$0xff]  }
 0x127   :  { %v433_v39 = vrot.slane %v432_v34, 1  ;;  %v468_v43 = vpack.c.bf16 %v460_v35, %v460_v35  ;;  %v1392_v35 = vld [vmem:[%s1826_s9 + $0x8] sm:$0xff]  }
 0x128   :  { %v453_v42 = vadd.f32 %v440_v8, %v425_v37  ;;  %v521_v3 = vrot.slane %v514_v53, 6  ;;  %v1221_v37 = vld [vmem:[%s1825_s8] ss:$0 sm:$0xff] }
 0x129   :  { %v434_v44 = vmax.f32 %v432_v34, %v433_v39  ;;  %v515_v55 = vunpack.c.l.b16 %v468_v43  ;;  %v1391_v34 = vld [vmem:[%s1826_s9 + $0x10] sm:$0xff]   ;;  %s1431_s9 = smov 48  }
 0x12a   :  { %v461_v50 = vmax.f32 %v453_v42, 0.0  ;;  %v523_v12 = vsel %vm522_vm6, %v521_v3, %v520_v9  ;;  %1278 = vmatpush3.bf16.msra.mxu0 %v1391_v34 }
 0x12b   :  { %v454_v51 = vadd.f32 %v444_v13, %v434_v44  ;;  %v529_v5 = vrot.slane %v515_v55, 6  ;;  %1279 = vmatprep.subr.bf16.mxu0 %v1424_v15 }
 0x12c   :  { %v469_v56 = vpack.c.bf16 %v461_v50, %v461_v50 }
 0x12d   :  { %v462_v60 = vmax.f32 %v454_v51, 0.0  ;;  %v530_v61 = vsel %vm522_vm6, %v529_v5, %v528_v10 }
 0x12e   :  { %v516_v0 = vunpack.c.l.b16 %v469_v56  ;;  %1280 = vmatpush3.bf16.msra.mxu0 %v1392_v35  ;;  %v1394_v56 = vld [vmem:[%s1829_s12] sm:$0xff]  }
 0x12f   :  { %v470_v1 = vpack.c.bf16 %v462_v60, %v462_v60  ;;  %1281 = vmatprep.subr.bf16.mxu0 %v1424_v15  ;;  %v1224_v60 = vld [vmem:[%s1827_s10] ss:$0 sm:$0xff] }
 0x130   :  { %v524_v6 = vrot.slane %v516_v0, 5 }
 0x131   :  { %v517_v8 = vunpack.c.l.b16 %v470_v1 }
 0x132   :  { %v526_v59 = vsel %vm525_vm7, %v524_v6, %v523_v12  ;;  %1282 = vmatpush3.bf16.msra.mxu0 %v1393_v36  ;;  %v938_v12 = vld [vmem:[%s1828_s11] sm:$0xf] }
 0x133   :  { %v531_v11 = vrot.slane %v517_v8, 5  ;;  %v533_v14 = vpack.c.b16 %v526_v59, %v526_v59  ;;  %1299 = vmatprep.subr.bf16.mxu0 %v1424_v15  ;;  %v1395_v59 = vld [vmem:[%s1831_s14 + $0x18] sm:$0xff]  }
 0x135   :  { %v532_v58 = vsel %vm525_vm7, %v531_v11, %v530_v61 }
 0x136   :  { %v534_v13 = vpack.c.b16 %v532_v58, %v532_v58  ;;  %v1396_v58 = vld [vmem:[%s1831_s14 + $0x10] sm:$0xff]  }
 0x138   :  { %1218 = vmatprep.mubr.msk.bf16.mxu1 %vm249_vm0, %v534_v13  ;;  %v1397_v13 = vld [vmem:[%s1831_s14 + $0x8] sm:$0xff]  }
 0x139   :  { %644 = vmatmul.mubr.bf16.vlgmr.msra.gmra.mxu1 %v533_v14  ;;  %v1398_v14 = vld [vmem:[%s1831_s14] sm:$0xff]  }
 0x13a   :  { %1264 = vmatpush3.bf16.msra.mxu1 %v1388_v16  ;;  %1265 = vmatprep.mubr.msk.bf16.mxu1 %vm1425_vm8, %v1424_v15  ;;  %v1232_v16 = vld [vmem:[%s1830_s13] ss:$0 sm:$0xff] }
 0x13b   :  { %1269 = vmatprep.subr.bf16.mxu1 %v1424_v15 }
 0x1f9   :  { %v645_v57 = vpop.f32.mrf.mxu1 }
 0x1fa   :  { %v646_v18 = vadd.f32 %v1205_v17, %v645_v57 }
 0x1fb   :  { %v647_v19 = vpop.f32.mrf.mxu1 }
 0x1fc   :  { %v651_v48 = vmax.f32 %v646_v18, 0.0 }
 0x1fd   :  { %v648_v20 = vpop.f32.mrf.mxu1 }
 0x1fe   :  { %v653_v21 = vrot.slane %v651_v48, 4 }
 0x1ff   :  { %v649_v22 = vpop.f32.mrf.mxu1 }
 0x200   :  { %660 = vrot.lane.b32.xlu1 %v653_v21, %s1426_s7  ;;  %654 = vrot.lane.b32.xlu0 %v653_v21, %s1427_s5 }
 0x204   :  { %657 = vrot.lane.b32.xlu0 %v651_v48, %s1428_s25 }
 0x272   :  { %v655_v23 = vpop.permute.xlu0 %654  ;;  %v661_v24 = vpop.permute.xlu1 %660 }
 0x273   :  { %v664_v26 = vsel %vm663_vm9, %v651_v48, %v655_v23 }
 0x276   :  { %v658_v25 = vpop.permute.xlu0 %657 }
 0x277   :  { %v665_v27 = vsel %vm663_vm9, %v658_v25, %v661_v24 }
 0x278   :  { %v666_v28 = vpack.c.bf16 %v665_v27, %v664_v26 }
 0x27a   :  { %1266 = vmatmul.mubr.msk.bf16.vlgmr.msra.gmra.mxu1 %vm675_vm10, %v666_v28 }
 0x27b   :  { %1271 = vmatprep.mubr.msk.bf16.mxu1 %vm1425_vm8, %v1424_v15 }
 0x33a   :  { %v713_v29 = vpop.f32.mrf.mxu1 }
 0x33c   :  { %v1267_v46 = vpop.f32.mrf.mxu1 }
 0x33d   :  { %v1399_v46 = vld [vmem:[%s1833_s16] sm:$0xff]   ;;  %s1161_s16 = sshll.u32 %s1432_s20, 4  ;;  %s1162_s16 = int_to_ptr.vmem [resolvable:$true] %s1161_s16 }
 0x33e   :  { %v716_v47 = vpop.f32.mrf.mxu1  ;;  %p1405_p1 = scmp.lt.s32.totalorder %s1162_s16, %s1162_s16 }
 0x33f   :  { %v722_v30 = vpack.c.bf16 %v716_v47, %v713_v29  ;;  %v1234_v47 = vld [vmem:[%s1832_s15] ss:$0 sm:$0xff]  ;;  %s1400_s15 = scalar_lea.vmem %s1162_s16, 32 }
 0x340   :  { %v1268_v31 = vpop.f32.mrf.mxu1  ;;  %p1401_p0 = scmp.ne.s32.totalorder %s1162_s16, %s1400_s15  ;;  %p1406_p2 = scmp.lt.s32.totalorder %s1400_s15, %s1400_s15 }
 0x341   :  { %1270 = vmatpush3.bf16.msra.mxu1 %v722_v30 }
 0x342   :  { %1287 = vmatprep.subr.bf16.mxu1 %v1424_v15  ;;  %p1407_p3 = por %p1406_p2, %p1405_p1 }
 0x344   :  { %1272 = vmatmul.mubr.msk.bf16.vlgmr.msra.gmra.mxu1 %vm675_vm10, %v1389_v32  ;;  %p1408_p4 = pnand %p1407_p3, %p1401_p0 }
 0x345   :  { %1289 = vmatprep.mubr.msk.bf16.mxu1 %vm1425_vm8, %v1424_v15  ;;  %1288 = vmatpush3.bf16.msra.mxu1 %v1394_v56 }
 0x346   :  { %1293 = vmatprep.subr.bf16.mxu1 %v1424_v15 }
 0x404   :  { %v772_v38 = vpop.f32.mrf.mxu1 }
 0x405   :  { %v773_v39 = vadd.f32 %v1221_v37, %v772_v38 }
 0x406   :  { %v1273_v40 = vpop.f32.mrf.mxu1 }
 0x407   :  { %v780_v41 = vrot.slane %v773_v39, 4 }
 0x408   :  { %v775_v42 = vpop.f32.mrf.mxu1 }
 0x409   :  { %v776_v43 = vadd.f32 %v1221_v37, %v775_v42  ;;  %781 = vrot.lane.b32.xlu1 %v780_v41, %s1429_s21  ;;  %v1240_v37 = vld [vmem:[%s1834_s17] ss:$0 sm:$0xff] }
 0x40a   :  { %v1274_v44 = vpop.f32.mrf.mxu1 }
 0x40b   :  { %v788_v45 = vrot.slane %v776_v43, 4  ;;  %785 = vrot.lane.b32.xlu0 %v776_v43, %s1430_s3 }
 0x40d   :  { %789 = vrot.lane.b32.xlu1 %v788_v45, %s1431_s9 }
 0x47b   :  { %v782_v49 = vpop.permute.xlu1 %781 }
 0x47c   :  { %v792_v50 = vsel %vm675_vm10, %v773_v39, %v782_v49 }
 0x47d   :  { %v786_v51 = vpop.permute.xlu0 %785 }
 0x47e   :  { %v794_v52 = vsel %vm793_vm11, %v792_v50, %v786_v51 }
 0x47f   :  { %v790_v53 = vpop.permute.xlu1 %789 }
 0x480   :  { %v796_v54 = vsel %vm795_vm12, %v794_v52, %v790_v53 }
 0x481   :  { %v797_v55 = vpack.c.bf16 %v796_v54, %v796_v54 }
 0x483   :  { %1284 = vmatmul.mubr.msk.bf16.vlgmr.msra.gmra.mxu0 %vm249_vm0, %v797_v55 }
 0x484   :  { %1307 = vmatprep.mubr.msk.bf16.mxu0 %vm1425_vm8, %v1424_v15  ;;  %1300 = vmatpush3.bf16.msra.mxu0 %v1395_v59 }
 0x485   :  { %1301 = vmatprep.subr.bf16.mxu0 %v1424_v15 }
 0x488   :  { %1302 = vmatpush3.bf16.msra.mxu0 %v1396_v58 }
 0x489   :  { %1303 = vmatprep.subr.bf16.mxu0 %v1424_v15 }
 0x48c   :  { %1304 = vmatpush3.bf16.msra.mxu0 %v1397_v13 }
 0x48d   :  { %1305 = vmatprep.subr.bf16.mxu0 %v1424_v15 }
 0x490   :  { %1306 = vmatpush3.bf16.msra.mxu0 %v1398_v14 }
 0x543   :  { %v874_v62 = vpop.f32.mrf.mxu0 }
 0x544   :  { %v875_v63 = vadd.f32 %v1224_v60, %v874_v62 }
 0x545   :  { %v1285_v0 = vpop.f32.mrf.mxu0 }
 0x546   :  { %v881_v1 = vrot.slane %v875_v63, 4 }
 0x547   :  { %v877_v2 = vpop.f32.mrf.mxu0 }
 0x548   :  { %882 = vrot.lane.b32.xlu0 %v881_v1, %s1427_s5 }
 0x549   :  { %v1286_v3 = vpop.f32.mrf.mxu0 }
 0x5ba   :  { %v883_v4 = vpop.permute.xlu0 %882 }
 0x5bb   :  { %v885_v5 = vsel %vm663_vm9, %v875_v63, %v883_v4 }
 0x5bc   :  { %v886_v6 = vpack.c.bf16 %v885_v5, %v885_v5 }
 0x5be   :  { %1290 = vmatmul.mubr.msk.bf16.vlgmr.msra.gmra.mxu1 %vm675_vm10, %v886_v6 }
 0x5bf   :  { %1295 = vmatprep.mubr.msk.bf16.mxu1 %vm1425_vm8, %v1424_v15 }
 0x67e   :  { %v932_v7 = vpop.f32.mrf.mxu1 }
 0x67f   :  { %v939_v8 = vpack.c.bf16 %v932_v7, %v932_v7 }
 0x680   :  { %v1291_v9 = vpop.f32.mrf.mxu1 }
 0x681   :  { %v952_v10 = vsel %vm663_vm9, %v939_v8, 0 }
 0x682   :  { %v935_v11 = vpop.f32.mrf.mxu1  ;;  %1294 = vmatpush3.bf16.msra.mxu1 %v952_v10 }
 0x683   :  { %1311 = vmatprep.subr.bf16.mxu1 %v1424_v15 }
 0x684   :  { %v1292_v61 = vpop.f32.mrf.mxu1 }
 0x685   :  { %1296 = vmatmul.mubr.msk.bf16.vlgmr.msra.gmra.mxu1 %vm947_vm13, %v938_v12 }
 0x686   :  { %1313 = vmatprep.mubr.msk.bf16.mxu1 %vm1425_vm8, %v1424_v15  ;;  %1312 = vmatpush3.bf16.msra.mxu1 %v1399_v46 }
 0x745   :  { %v988_v17 = vpop.f32.mrf.mxu1 }
 0x746   :  { %v989_v57 = vadd.f32 %v1232_v16, %v988_v17 }
 0x747   :  { %v1297_v18 = vpop.f32.mrf.mxu1 }
 0x748   :  { %v994_v19 = vmax.f32 %v989_v57, 0.0 }
 0x749   :  { %v991_v48 = vpop.f32.mrf.mxu1 }
 0x74a   :  { %v996_v20 = vrot.slane %v994_v19, 2  ;;  %v1000_v21 = vrot.slane %v994_v19, 4  ;;  %v1004_v15 = vrot.slane %v994_v19, 6 }
 0x74b   :  { %v1298_v22 = vpop.f32.mrf.mxu1 }
 0x74c   :  { %997 = vrot.lane.b32.xlu1 %v996_v20, %s1429_s21  ;;  %1001 = vrot.lane.b32.xlu0 %v1000_v21, %s1430_s3 }
 0x750   :  { %1005 = vrot.lane.b32.xlu1 %v1004_v15, %s1431_s9 }
 0x7be   :  { %v998_v23 = vpop.permute.xlu1 %997  ;;  %v1002_v25 = vpop.permute.xlu0 %1001 }
 0x7bf   :  { %v1008_v24 = vsel %vm675_vm10, %v994_v19, %v998_v23 }
 0x7c0   :  { %v1009_v26 = vsel %vm793_vm11, %v1008_v24, %v1002_v25 }
 0x7c2   :  { %v1006_v27 = vpop.permute.xlu1 %1005 }
 0x7c3   :  { %v1010_v28 = vsel %vm795_vm12, %v1009_v26, %v1006_v27 }
 0x7c4   :  { %v1011_v29 = vpack.c.bf16 %v1010_v28, %v1010_v28 }
 0x7c6   :  { %1308 = vmatmul.mubr.msk.bf16.vlgmr.msra.gmra.mxu0 %vm249_vm0, %v1011_v29 }
 0x886   :  { %v1088_v30 = vpop.f32.mrf.mxu0 }
 0x887   :  { %v1089_v31 = vadd.f32 %v1234_v47, %v1088_v30 }
 0x888   :  { %v1309_v32 = vpop.f32.mrf.mxu0 }
 0x889   :  { %v1094_v33 = vmax.f32 %v1089_v31, 0.0 }
 0x88a   :  { %v1091_v34 = vpop.f32.mrf.mxu0 }
 0x88b   :  { %v1095_v35 = vpack.c.bf16 %v1094_v33, %v1094_v33 }
 0x88c   :  { %v1310_v36 = vpop.f32.mrf.mxu0 }
 0x88d   :  { %1314 = vmatmul.mubr.msk.bf16.vlgmr.msra.gmra.mxu1 %vm675_vm10, %v1095_v35 }
 0x94d   :  { %v1148_v38 = vpop.f32.mrf.mxu1 }
 0x94e   :  { %v1149_v39 = vadd.f32 %v1240_v37, %v1148_v38 }
 0x94f   :  { %v1315_v40 = vpop.f32.mrf.mxu1 }
 0x950   :  { %1154 = vst [vmem:[#allocation2] sm:$0x3] %v1149_v39 }
 0x951   :  { %v1151_v41 = vpop.f32.mrf.mxu1 }
 0x952   :  { %1411 = shalt.err (!%p1408_p4)
}
 0x953   :  { %1164 = dma.vmem_to_hbm [thread:$0]  %s1162_s16, 32, %s1835_s18, [#allocation3]   ;;  %v1316_v42 = vpop.f32.mrf.mxu1 }
 0x954   :  { %1420 = dma.done.wait [#allocation3], 32  }
 0x955   :  { %1421 = vsyncadd [#allocation3], 4294967264 }
 0x956   :  { %1168 = vsyncpa [#allocation3], 1 }

</bundles_post_ra>
